<compile_context>
chip_gen: v7x
topology: tpu7x:2x2x1
jax: 0.10.0
libtpu: 0.0.40
codegen_flags: <defaults>
</compile_context>

<pallas_src>
import jax
import jax.numpy as jnp
from jax import lax
from jax.experimental import pallas as pl
from jax.experimental.pallas import tpu as pltpu


def _round_up(x: int, m: int) -> int:
    return (x + m - 1) // m * m


def meanpool_classifier_kernel(x_ref, len_ref, w_ref, b_ref, feat_ref, out_ref):
    """Fused length-masked mean-pool + Linear (MeanPoolClassifier, eval mode).

    x_ref:    (tile_b, S, D)   last-LSTM-layer features (f32 or bf16, streamed unpadded)
    len_ref:  (tile_b, 1)      float sequence lengths (padded rows hold 1.0)
    w_ref:    (D, C_pad)       classifier weight, x @ W layout (== PyTorch W.T), cols zero-padded
    b_ref:    (1, C_pad)       classifier bias, zero-padded
    feat_ref: (tile_b, D)      pooled features (== dropout(pooled) at eval)
    out_ref:  (tile_b, C_pad)  logits (lane-dense; real classes in the first C columns)
    """
    x = x_ref[...].astype(jnp.float32)            # bf16 stream -> f32 vregs (no-op for f32 input)
    lengths = len_ref[...]                        # (tb, 1) f32
    tb, s, d = x.shape

    # mask[b, t, :] = t < lengths[b]; built directly in 3-D so the iota lives on the sublane
    # axis (dim=1) and no lane->sublane relayout is needed.
    t_idx = lax.broadcasted_iota(jnp.int32, (tb, s, d), 1)
    mask = t_idx < lengths.astype(jnp.int32)[:, :, None]
    summed = jnp.sum(jnp.where(mask, x, 0.0), axis=1)            # (tb, D) f32

    # Mean: reciprocal on the EUP (full precision), multiply on the VPU.
    inv_len = pl.reciprocal(lengths, approx=False)               # (tb, 1)
    pooled = summed * inv_len                                    # (tb, D)

    # Dropout(p=0.6) is the identity in eval mode.
    feat_ref[...] = pooled.astype(feat_ref.dtype)

    # Linear head on the MXU with f32 accumulation (K = D = 300, N = C_pad = 128).
    logits = jnp.dot(pooled, w_ref[...], preferred_element_type=jnp.float32)
    out_ref[...] = (logits + b_ref[...]).astype(out_ref.dtype)


def meanpool_classifier_forward(features, lengths, w, b, *, tile_b=None):
    """features: [B, S, D] (f32 or bf16), lengths: [B] int, w: [D, C], b: [C].

    Returns (pooled_features [B, D] f32, logits [B, C] f32) — SentimentClassifier's head output.
    """
    B, S, D = features.shape
    C = w.shape[1]
    C_pad = _round_up(C, 128)                     # lane-dense logits store
    f32 = jnp.float32
    bytes_per_row = S * D * jnp.dtype(features.dtype).itemsize

    # --- chip-aware VMEM budgeting ----------------------------------------------------------
    try:
        info = pltpu.get_tpu_info()
        vmem_phys = int(getattr(info, "vmem_capacity_bytes", 64 * 1024 * 1024))
    except Exception:                             # conservative fallback (v7x-sized VMEM)
        vmem_phys = 64 * 1024 * 1024
    two_tc = vmem_phys <= 80 * 1024 * 1024        # v7x-like: 64 MiB/TC, 2 TensorCores per chip
    per_buf_budget = max(512 * 1024, vmem_phys // 8)             # x is double-buffered -> 2x this
    vmem_limit = min(96 * 1024 * 1024, (vmem_phys * 3) // 4)     # explicit scoped-VMEM limit

    if tile_b is None:
        cap = max(8, (per_buf_budget // max(1, bytes_per_row)) // 8 * 8)
        if two_tc and B > 16:
            # Keep >= 2 grid steps so dimension_semantics=("parallel",) can feed both cores.
            cap = min(cap, _round_up(pl.cdiv(B, 2), 8))
        tile_b = B if B <= cap else min(cap, 1024)
    tile_b = int(tile_b)
    if tile_b >= B:
        tile_b = B                                # single block == full array; no padding at all
    else:
        tile_b = max(8, _round_up(tile_b, 8))     # multiple of 8 for the (tile_b, *) output blocks

    grid_b = pl.cdiv(B, tile_b)
    B_pad = grid_b * tile_b                       # only lengths/outputs see this; x stays unpadded

    # Tiny operands only: lengths (padded rows get len=1 so 1/len stays finite), weight, bias.
    if B_pad == B:
        len_p = lengths.astype(f32).reshape(B, 1)
    else:
        len_p = jnp.ones((B_pad, 1), f32).at[:B, 0].set(lengths.astype(f32))
    w_p = jnp.zeros((D, C_pad), f32).at[:, :C].set(w.astype(f32))
    b_p = jnp.zeros((1, C_pad), f32).at[0, :C].set(b.astype(f32))

    cost = pl.CostEstimate(
        flops=2 * B * S * D + 2 * B * D * C_pad,
        transcendentals=B,
        bytes_accessed=(features.size * jnp.dtype(features.dtype).itemsize
                        + 4 * (len_p.size + w_p.size + b_p.size
                               + B_pad * D + B_pad * C_pad)),
    )

    feats, logits = pl.pallas_call(
        meanpool_classifier_kernel,
        out_shape=(
            jax.ShapeDtypeStruct((B_pad, D), f32),
            jax.ShapeDtypeStruct((B_pad, C_pad), f32),
        ),
        grid_spec=pltpu.PrefetchScalarGridSpec(
            num_scalar_prefetch=0,
            grid=(grid_b,),
            in_specs=[
                pl.BlockSpec((tile_b, S, D), lambda i: (i, 0, 0)),   # features: full (S, D), no copy
                pl.BlockSpec((tile_b, 1), lambda i: (i, 0)),          # lengths
                pl.BlockSpec((D, C_pad), lambda i: (0, 0)),           # weight (VMEM resident)
                pl.BlockSpec((1, C_pad), lambda i: (0, 0)),           # bias   (VMEM resident)
            ],
            out_specs=[
                pl.BlockSpec((tile_b, D), lambda i: (i, 0)),          # pooled features
                pl.BlockSpec((tile_b, C_pad), lambda i: (i, 0)),      # logits (lane-dense)
            ],
        ),
        compiler_params=pltpu.CompilerParams(
            dimension_semantics=("parallel",),
            vmem_limit_bytes=vmem_limit,
        ),
        cost_estimate=cost,
    )(features, len_p, w_p, b_p)

    # Slice batch padding (discarded, possibly-garbage rows) and the lane padding on C.
    return feats[:B], logits[:B, :C]


def reference_forward(features, lengths, w, b):
    """Pure-JAX mirror of MeanPoolClassifier.forward (eval mode), f32 math."""
    x = features.astype(jnp.float32)
    B, S, D = x.shape
    idx = jnp.arange(S)[None, :]
    mask = (idx < lengths[:, None]).astype(jnp.float32)
    pooled = (x * mask[:, :, None]).sum(axis=1) / lengths.astype(jnp.float32)[:, None]
    return pooled, pooled @ w.astype(jnp.float32) + b.astype(jnp.float32)


if __name__ == "__main__":
    # Small shapes consistent with the module: MeanPoolClassifier(input_size=300, n_classes=2)
    # applied to the LSTM LM's last-layer outputs raw_outputs[-1] of shape [batch, seq, 300].
    batch, seq, feat_dim, n_classes = 8, 16, 300, 2

    key = jax.random.PRNGKey(0)
    kx, kl, kw, kb = jax.random.split(key, 4)
    x = jax.random.normal(kx, (batch, seq, feat_dim), jnp.float32)   # stands in for raw_outputs[-1]
    lengths = jax.random.randint(kl, (batch,), 1, seq + 1)
    bound = 1.0 / (feat_dim ** 0.5)                                  # nn.Linear default init
    w = jax.random.uniform(kw, (feat_dim, n_classes), jnp.float32, -bound, bound)
    b = jax.random.uniform(kb, (n_classes,), jnp.float32, -bound, bound)

    # 1) f32 features, single-block grid (no padding anywhere).
    feats, logits = jax.block_until_ready(meanpool_classifier_forward(x, lengths, w, b))
    ref_feats, ref_logits = reference_forward(x, lengths, w, b)
    assert feats.shape == (batch, feat_dim) and logits.shape == (batch, n_classes)
    assert jnp.allclose(feats, ref_feats, atol=1e-5, rtol=1e-5), "pooled features mismatch (f32)"
    assert jnp.allclose(logits, ref_logits, atol=1e-4, rtol=1e-4), "logits mismatch (f32)"

    # 2) bf16-streamed features (how the backbone would feed the head; halves the HBM read).
    x_bf16 = x.astype(jnp.bfloat16)
    feats16, logits16 = jax.block_until_ready(meanpool_classifier_forward(x_bf16, lengths, w, b))
    ref_feats16, ref_logits16 = reference_forward(x_bf16, lengths, w, b)
    assert jnp.allclose(feats16, ref_feats16, atol=1e-5, rtol=1e-5), "pooled features mismatch (bf16)"
    assert jnp.allclose(logits16, ref_logits16, atol=1e-4, rtol=1e-4), "logits mismatch (bf16)"

    # 3) Ragged batch, multi-step grid: B=13 with tile_b=8 -> grid=2, last block partial
    #    (out-of-bounds feature rows are discarded; lengths padded with 1.0 keep math finite).
    kx2, kl2 = jax.random.split(jax.random.PRNGKey(1))
    xr = jax.random.normal(kx2, (13, seq, feat_dim), jnp.float32)
    lr = jax.random.randint(kl2, (13,), 1, seq + 1)
    feats_r, logits_r = jax.block_until_ready(
        meanpool_classifier_forward(xr, lr, w, b, tile_b=8))
    ref_feats_r, ref_logits_r = reference_forward(xr, lr, w, b)
    assert feats_r.shape == (13, feat_dim) and logits_r.shape == (13, n_classes)
    assert jnp.allclose(feats_r, ref_feats_r, atol=1e-5, rtol=1e-5), "pooled features mismatch (ragged)"
    assert jnp.allclose(logits_r, ref_logits_r, atol=1e-4, rtol=1e-4), "logits mismatch (ragged)"

    print("KERNEL_OK")
</pallas_src>

<mosaic_0001>
module attributes {stable_mosaic.version = 11 : i64} {
  func.func @meanpool_classifier_kernel(%arg0: i32, %arg1: memref<8x16x300xf32, #tpu.memory_space<vmem>>, %arg2: memref<8x1xf32, #tpu.memory_space<vmem>>, %arg3: memref<300x128xf32, #tpu.memory_space<vmem>>, %arg4: memref<1x128xf32, #tpu.memory_space<vmem>>, %arg5: memref<8x300xf32, #tpu.memory_space<vmem>>, %arg6: memref<8x128xf32, #tpu.memory_space<vmem>>) attributes {dimension_semantics = [#tpu.dimension_semantics<parallel>], iteration_bounds = array<i64: 1>, scalar_prefetch = 0 : i64, scratch_operands = 0 : i64, tpu.core_type = #tpu.core_type<tc>, window_params = [{transform_indices = @transform_0, window_bounds = array<i64: 8, 16, 300>}, {transform_indices = @transform_1, window_bounds = array<i64: 8, 1>}, {pipeline_mode = #tpu.pipeline_mode<synchronous>, transform_indices = @transform_2, window_bounds = array<i64: 300, 128>}, {pipeline_mode = #tpu.pipeline_mode<synchronous>, transform_indices = @transform_3, window_bounds = array<i64: 1, 128>}, {transform_indices = @transform_4, window_bounds = array<i64: 8, 300>}, {transform_indices = @transform_5, window_bounds = array<i64: 8, 128>}]} {
    %c0 = arith.constant 0 : index
    %c0_0 = arith.constant 0 : index
    %c0_1 = arith.constant 0 : index
    %0 = vector.load %arg1[%c0, %c0_0, %c0_1] : memref<8x16x300xf32, #tpu.memory_space<vmem>>, vector<8x16x300xf32>
    %c0_2 = arith.constant 0 : index
    %c0_3 = arith.constant 0 : index
    %1 = vector.load %arg2[%c0_2, %c0_3] : memref<8x1xf32, #tpu.memory_space<vmem>>, vector<8x1xf32>
    %2 = tpu.iota {dimensions = array<i32: 1>} : vector<8x16x300xi32>
    %3 = arith.fptosi %1 : vector<8x1xf32> to vector<8x1xi32>
    %4 = vector.shape_cast %3 : vector<8x1xi32> to vector<8x1x1xi32>
    %5 = vector.broadcast %4 : vector<8x1x1xi32> to vector<8x16x300xi32>
    %6 = arith.cmpi slt, %2, %5 : vector<8x16x300xi32>
    %cst = arith.constant 0.000000e+00 : f32
    %7 = vector.broadcast %cst : f32 to vector<8x16x300xf32>
    %8 = arith.select %6, %0, %7 : vector<8x16x300xi1>, vector<8x16x300xf32>
    %cst_4 = arith.constant dense<0.000000e+00> : vector<8x300xf32>
    %9 = vector.multi_reduction <add>, %8, %cst_4 [1] : vector<8x16x300xf32> to vector<8x300xf32>
    %10 = tpu.reciprocal %1 : vector<8x1xf32> -> vector<8x1xf32>
    %11 = vector.broadcast %10 : vector<8x1xf32> to vector<8x300xf32>
    %12 = arith.mulf %9, %11 : vector<8x300xf32>
    %c0_5 = arith.constant 0 : index
    %c0_6 = arith.constant 0 : index
    %13 = vector.load %arg5[%c0_5, %c0_6] : memref<8x300xf32, #tpu.memory_space<vmem>>, vector<8x300xf32>
    tpu.vector_store %arg5[%c0_5, %c0_6], %12 {strides = array<i32>} : memref<8x300xf32, #tpu.memory_space<vmem>>, vector<8x300xf32>,
    %c0_7 = arith.constant 0 : index
    %c0_8 = arith.constant 0 : index
    %14 = vector.load %arg3[%c0_7, %c0_8] : memref<300x128xf32, #tpu.memory_space<vmem>>, vector<300x128xf32>
    %cst_9 = arith.constant dense<0.000000e+00> : vector<8x128xf32>
    %15 = tpu.matmul %12, %14, %cst_9 {dimension_numbers = #tpu.dot_dimension_numbers<[1], [0], [0], [1], [0, 0, 1, 1], [], []>} : vector<8x300xf32>, vector<300x128xf32>, vector<8x128xf32> -> vector<8x128xf32>
    %c0_10 = arith.constant 0 : index
    %c0_11 = arith.constant 0 : index
    %16 = vector.load %arg4[%c0_10, %c0_11] : memref<1x128xf32, #tpu.memory_space<vmem>>, vector<1x128xf32>
    %17 = vector.broadcast %16 : vector<1x128xf32> to vector<8x128xf32>
    %18 = arith.addf %15, %17 : vector<8x128xf32>
    %c0_12 = arith.constant 0 : index
    %c0_13 = arith.constant 0 : index
    %19 = vector.load %arg6[%c0_12, %c0_13] : memref<8x128xf32, #tpu.memory_space<vmem>>, vector<8x128xf32>
    tpu.vector_store %arg6[%c0_12, %c0_13], %18 {strides = array<i32>} : memref<8x128xf32, #tpu.memory_space<vmem>>, vector<8x128xf32>,
    return
  }
  func.func @transform_0(%arg0: i32) -> (i32, i32, i32) {
    %c0_i32 = arith.constant 0 : i32
    %c0_i32_0 = arith.constant 0 : i32
    %c0_i32_1 = arith.constant 0 : i32
    return %arg0, %c0_i32, %c0_i32_0 : i32, i32, i32
  }
  func.func @transform_1(%arg0: i32) -> (i32, i32) {
    %c0_i32 = arith.constant 0 : i32
    %c0_i32_0 = arith.constant 0 : i32
    return %arg0, %c0_i32 : i32, i32
  }
  func.func @transform_2(%arg0: i32) -> (i32, i32) {
    %c0_i32 = arith.constant 0 : i32
    %c0_i32_0 = arith.constant 0 : i32
    %c0_i32_1 = arith.constant 0 : i32
    return %c0_i32, %c0_i32_0 : i32, i32
  }
  func.func @transform_3(%arg0: i32) -> (i32, i32) {
    %c0_i32 = arith.constant 0 : i32
    %c0_i32_0 = arith.constant 0 : i32
    %c0_i32_1 = arith.constant 0 : i32
    return %c0_i32, %c0_i32_0 : i32, i32
  }
  func.func @transform_4(%arg0: i32) -> (i32, i32) {
    %c0_i32 = arith.constant 0 : i32
    %c0_i32_0 = arith.constant 0 : i32
    return %arg0, %c0_i32 : i32, i32
  }
  func.func @transform_5(%arg0: i32) -> (i32, i32) {
    %c0_i32 = arith.constant 0 : i32
    %c0_i32_0 = arith.constant 0 : i32
    return %arg0, %c0_i32 : i32, i32
  }
}

</mosaic_0001>

<bundles_post_ra>
// kernel: tpu_custom_call.1
= control target key start
LH: loop header
LB: loop body
LE: loop exit
PB: predicated region body
PF: predicated region fallthrough
CT: control target
= control target key end

     0   :  { %11 = vsyncpa [#allocation3], 0  ;;  %s1320_s0 = inlined_call_operand.hbm [shape: f32[8,16,300], index: 0, kind: input, shape index: {}]   ;;  %s1321_s1 = inlined_call_operand.vmem [shape: f32[8,1], index: 1, kind: input, shape index: {}]   ;;  %s1322_s2 = inlined_call_operand.hbm [shape: f32[300,128], index: 2, kind: input, shape index: {}]   ;;  %s1323_s3 = inlined_call_operand.vmem [shape: f32[1,128], index: 3, kind: input, shape index: {}]   ;;  %s1324_s4 = inlined_call_operand.hbm [shape: f32[8,300], index: 4, kind: output, shape index: {0}]   ;;  %s1325_s5 = inlined_call_operand.hbm [shape: f32[8,128], index: 5, kind: output, shape index: {1}]  }
   0x1   :  { %12 = vsyncpa [#allocation6], 0 }
   0x2   :  { %13 = vsyncpa [#allocation4], 0 }
   0x3   :  { %14 = vsyncpa [#allocation9], 0  ;;  %s1019_s18 = smov [#allocation2]   ;;  %s923_s22 = scalar_lea.hbm %s1320_s0, 6144 }
   0x4   :  { %s20_s19 = sshll.u32 %s1019_s18, 4  ;;  %p924_p0 = scmp.ne.s32.totalorder %s1320_s0, %s923_s22  ;;  %s21_s19 = int_to_ptr.vmem [resolvable:$true] %s20_s19 }
   0x5   :  { %p927_p1 = scmp.lt.u32.totalorder %s923_s22, %s1320_s0 }
   0x7   :  { %p929_p2 = pnand %p927_p1, %p924_p0 }
   0x9   :  { %932 = shalt.err (!%p929_p2)
}
   0xa   :  { %s933_s27 = scalar_lea.vmem %s21_s19, 6144  ;;  %p938_p4 = scmp.lt.s32.totalorder %s21_s19, %s21_s19 }
   0xb   :  { %p934_p3 = scmp.ne.s32.totalorder %s21_s19, %s933_s27  ;;  %p939_p5 = scmp.lt.s32.totalorder %s933_s27, %s933_s27 }
   0xd   :  { %p940_p6 = por %p939_p5, %p938_p4 }
   0xf   :  { %p941_p7 = pnand %p940_p6, %p934_p3 }
  0x11   :  { %944 = shalt.err (!%p941_p7)
}
  0x12   :  { %s1020_s28 = smov 384   ;;  %s1021_s29 = smov 24  }
  0x13   :  { %26 = dma.hbm_to_vmem [thread:$0]  %s1320_s0, 6144, %s21_s19, [#allocation3], %s1020_s28, %s1020_s28, %s1021_s29  }
  0x14   :  { %s1022_s7 = smov [#allocation5]   ;;  %s945_s11 = scalar_lea.hbm %s1322_s2, 4864 }
  0x15   :  { %s34_s8 = sshll.u32 %s1022_s7, 4  ;;  %p946_p8 = scmp.ne.s32.totalorder %s1322_s2, %s945_s11  ;;  %s35_s8 = int_to_ptr.vmem [resolvable:$true] %s34_s8 }
  0x16   :  { %p949_p9 = scmp.lt.u32.totalorder %s945_s11, %s1322_s2 }
  0x18   :  { %p951_p10 = pnand %p949_p9, %p946_p8 }
  0x1a   :  { %954 = shalt.err (!%p951_p10)
}
  0x1b   :  { %s955_s16 = scalar_lea.vmem %s35_s8, 4864  ;;  %p960_p12 = scmp.lt.s32.totalorder %s35_s8, %s35_s8 }
  0x1c   :  { %p956_p11 = scmp.ne.s32.totalorder %s35_s8, %s955_s16  ;;  %p961_p13 = scmp.lt.s32.totalorder %s955_s16, %s955_s16 }
  0x1e   :  { %p962_p0 = por %p961_p13, %p960_p12 }
  0x20   :  { %p963_p1 = pnand %p962_p0, %p956_p11 }
  0x22   :  { %966 = shalt.err (!%p963_p1)
}
  0x23   :  { %s1023_s0 = smov 128   ;;  %s1024_s17 = smov 8  }
  0x24   :  { %40 = dma.hbm_to_vmem [thread:$0]  %s1322_s2, 4864, %s35_s8, [#allocation6], %s1023_s0, %s1023_s0, %s1024_s17  }
  0x25   :  { %1011 = dma.done.wait [#allocation3], 6144  }
  0x26   :  { %1012 = vsyncadd [#allocation3], 4294961152 }
  0x27   :  { %1013 = dma.done.wait [#allocation6], 4864  }
  0x28   :  { %1014 = vsyncadd [#allocation6], 4294962432  ;;  %v98_v0 = vlaneseq  ;;  %v1025_v1 = vmov 0   ;;  %v1026_v2 = vmov 1966171168   ;;  %v97_v6 = vld [vmem:[%s1321_s1] sm:$0xff] }
  0x29   :  { %919 = vset.pattern.permute.xlu1 %v1025_v1  ;;  %v104_v3 = vunpack.c.l.s4 %v1026_v2  ;;  %920 = vset.pattern.permute.xlu0 %v1025_v1  ;;  %v903_v7 = vtrunc.f32 %v97_v6  ;;  %921 = vrcp.f32 %v97_v6  ;;  %v595_v32 = vld [vmem:[#allocation5 + $0x80] sm:$0xff]  ;;  %v596_v33 = vld [vmem:[#allocation5 + $0x88] sm:$0xff]  ;;  %v597_v39 = vld [vmem:[#allocation5 + $0x90] sm:$0xff]  ;;  %vm626_vm0 = vcmask 1043456   ;;  %s1031_s1 = smov [#allocation7]  }
  0x2a   :  { %v1087_v4 = vshrl.u32 %v98_v0, 7  ;;  %v861_v34 = vpack.c.bf16 %v596_v33, %v595_v32  ;;  %v579_v36 = vld [vmem:[#allocation5] sm:$0xff]  ;;  %v580_v37 = vld [vmem:[#allocation5 + $0x8] sm:$0xff]  ;;  %v598_v40 = vld [vmem:[#allocation5 + $0x98] sm:$0xff]  ;;  %vm1028_vm1 = vmmov 1   ;;  %vm1029_vm3 = vmmov 0  }
  0x2b   :  { %v105_v5 = vunpack.c.0.s8 %v104_v3  ;;  %v904_v9 = vcvt.f32.s32 %v903_v7  ;;  %v863_v38 = vpack.c.bf16 %v580_v37, %v579_v36  ;;  %v865_v41 = vpack.c.bf16 %v598_v40, %v597_v39  ;;  %v581_v42 = vld [vmem:[#allocation5 + $0x10] sm:$0xff]  ;;  %v582_v43 = vld [vmem:[#allocation5 + $0x18] sm:$0xff]  ;;  %v599_v45 = vld [vmem:[#allocation5 + $0xa0] sm:$0xff]  ;;  %s777_s2 = sshll.u32 %s1031_s1, 4  ;;  %s778_s2 = int_to_ptr.vmem [resolvable:$true] %s777_s2 }
  0x2c   :  { %v153_v11 = vsub.s32 0, %v1087_v4  ;;  %862 = vmatprep.subr.bf16.mxu0 %v861_v34  ;;  %v867_v44 = vpack.c.bf16 %v582_v43, %v581_v42  ;;  %v600_v46 = vld [vmem:[#allocation5 + $0xa8] sm:$0xff]  ;;  %v583_v48 = vld [vmem:[#allocation5 + $0x20] sm:$0xff]  ;;  %v601_v51 = vld [vmem:[#allocation5 + $0xb0] sm:$0xff]  ;;  %vm285_vm4 = vcmask 359424   ;;  %s967_s22 = scalar_lea.vmem %s778_s2, 384  ;;  %p972_p3 = scmp.lt.s32.totalorder %s778_s2, %s778_s2 }
  0x2d   :  { %v108_v8 = vsub.s32 %v105_v5, %v1087_v4  ;;  %v102_v12 = vcombine.high %v904_v9, %v904_v9  ;;  %864 = vmatpush3.bf16.msra.mxu0 %v863_v38  ;;  %v869_v47 = vpack.c.bf16 %v600_v46, %v599_v45  ;;  %v584_v49 = vld [vmem:[#allocation5 + $0x28] sm:$0xff]  ;;  %v602_v52 = vld [vmem:[#allocation5 + $0xb8] sm:$0xff]  ;;  %v585_v54 = vld [vmem:[#allocation5 + $0x30] sm:$0xff]  ;;  %p968_p2 = scmp.ne.s32.totalorder %s778_s2, %s967_s22  ;;  %p973_p4 = scmp.lt.s32.totalorder %s967_s22, %s967_s22 }
  0x2e   :  { %866 = vmatprep.subr.bf16.mxu0 %v865_v41  ;;  %v871_v50 = vpack.c.bf16 %v584_v49, %v583_v48  ;;  %v873_v53 = vpack.c.bf16 %v602_v52, %v601_v51  ;;  %v586_v55 = vld [vmem:[#allocation5 + $0x38] sm:$0xff]  ;;  %v603_v57 = vld [vmem:[#allocation5 + $0xc0] sm:$0xff]  ;;  %v604_v58 = vld [vmem:[#allocation5 + $0xc8] sm:$0xff] }
  0x2f   :  { %v109_v10 = vrot.slane %v904_v9, %v108_v8  ;;  %v116_v15 = vrot.slane %v102_v12, %v108_v8  ;;  %v875_v56 = vpack.c.bf16 %v586_v55, %v585_v54  ;;  %v877_v59 = vpack.c.bf16 %v604_v58, %v603_v57  ;;  %v587_v60 = vld [vmem:[#allocation5 + $0x40] sm:$0xff]  ;;  %v588_v61 = vld [vmem:[#allocation5 + $0x48] sm:$0xff]  ;;  %v605_v63 = vld [vmem:[#allocation5 + $0xd0] sm:$0xff]  ;;  %p974_p5 = por %p973_p4, %p972_p3 }
  0x30   :  { %v879_v62 = vpack.c.bf16 %v588_v61, %v587_v60  ;;  %v606_v0 = vld [vmem:[#allocation5 + $0xd8] sm:$0xff]  ;;  %v589_v2 = vld [vmem:[#allocation5 + $0x50] sm:$0xff]  ;;  %v611_v5 = vld [vmem:[#allocation5 + $0x100] sm:$0xff] }
  0x31   :  { %v125_v13 = vrot.slane %v109_v10, %v108_v8  ;;  %v117_v14 = vcombine.high %v109_v10, %v109_v10  ;;  %v118_v19 = vcombine.high %v116_v15, %v116_v15  ;;  %v132_v25 = vrot.slane %v116_v15, %v108_v8  ;;  %868 = vmatpush3.bf16.msra.mxu0 %v867_v44  ;;  %v590_v3 = vld [vmem:[#allocation5 + $0x58] sm:$0xff]  ;;  %v612_v7 = vld [vmem:[#allocation5 + $0x108] sm:$0xff]  ;;  %v607_v10 = vld [vmem:[#allocation5 + $0xe0] sm:$0xff]  ;;  %p975_p6 = pnand %p974_p5, %p968_p2 }
  0x32   :  { %870 = vmatprep.subr.bf16.mxu0 %v869_v47  ;;  %v881_v1 = vpack.c.bf16 %v606_v0, %v605_v63  ;;  %v883_v6 = vpack.c.bf16 %v590_v3, %v589_v2  ;;  %v894_v9 = vpack.c.bf16 %v612_v7, %v611_v5  ;;  %v613_v15 = vld [vmem:[#allocation5 + $0x110] sm:$0xff]  ;;  %vm901_vm2 = vmpackc.low %vm626_vm0, %vm1028_vm1  ;;  %v52_v33 = vld [vmem:[#allocation2 + $0x18] sm:$0xff] }
  0x33   :  { %v154_v16 = vrot.slane %v125_v13, %v153_v11  ;;  %v147_v17 = vcombine.high %v125_v13, %v125_v13  ;;  %v139_v18 = vrot.slane %v117_v14, %v108_v8  ;;  %v146_v22 = vrot.slane %v118_v19, %v108_v8  ;;  %v922_v35 = vpop.eup %921  ;;  %v591_v13 = vld [vmem:[#allocation5 + $0x60] sm:$0xff]  ;;  %v592_v14 = vld [vmem:[#allocation5 + $0x68] sm:$0xff]  ;;  %v609_v19 = vld [vmem:[#allocation5 + $0xf0] sm:$0xff] }
  0x34   :  { %v170_v28 = vrot.slane %v132_v25, %v153_v11  ;;  %v148_v29 = vcombine.high %v132_v25, %v132_v25  ;;  %v1027_v8 = vmov 0.0|0.0   ;;  %v616_v25 = vld [vmem:[#allocation5 + $0x128] sm:$0xf]  ;;  %v51_v32 = vld [vmem:[#allocation2 + $0x10] sm:$0xff]  ;;  %v56_v43 = vld [vmem:[#allocation2 + $0x38] sm:$0xff] }
  0x35   :  { %184 = vperm.xlu1 %919, %v154_v16   ;;  %v158_v20 = vrot.slane %v139_v18, %v153_v11  ;;  %v149_v21 = vcombine.high %v139_v18, %v139_v18  ;;  %v162_v24 = vrot.slane %v147_v17, %v153_v11  ;;  %v174_v26 = vrot.slane %v146_v22, %v153_v11  ;;  %v614_v17 = vld [vmem:[#allocation5 + $0x118] sm:$0xff]  ;;  %v54_v36 = vld [vmem:[#allocation2 + $0x28] sm:$0xff]  ;;  %v55_v42 = vld [vmem:[#allocation2 + $0x30] sm:$0xff] }
  0x36   :  { %v150_v27 = vcombine.high %v146_v22, %v146_v22  ;;  %v178_v31 = vrot.slane %v148_v29, %v153_v11  ;;  %872 = vmatpush3.bf16.msra.mxu0 %v871_v50  ;;  %893 = vmatprep.subr.bf16.mxu1 %v1027_v8  ;;  %v887_v16 = vpack.c.bf16 %v592_v14, %v591_v13  ;;  %v1095_v29 = vadd.s32 8, %v1087_v4  ;;  %v57_v48 = vld [vmem:[#allocation2 + $0x40] sm:$0xff]  ;;  %v58_v49 = vld [vmem:[#allocation2 + $0x48] sm:$0xff]  ;;  %v59_v50 = vld [vmem:[#allocation2 + $0x50] sm:$0xff] }
  0x37   :  { %187 = vperm.xlu0 %920, %v158_v20   ;;  %v166_v23 = vrot.slane %v149_v21, %v153_v11  ;;  %874 = vmatprep.subr.bf16.mxu0 %v873_v53  ;;  %v897_v18 = vpack.c.bf16 %v614_v17, %v613_v15  ;;  %v610_v20 = vld [vmem:[#allocation5 + $0xf8] sm:$0xff]  ;;  %v593_v21 = vld [vmem:[#allocation5 + $0x70] sm:$0xff] }
  0x38   :  { %v182_v30 = vrot.slane %v150_v27, %v153_v11  ;;  %v608_v11 = vld [vmem:[#allocation5 + $0xe8] sm:$0xff]  ;;  %895 = vmatpush3.bf16.msra.mxu1 %v894_v9  ;;  %v889_v22 = vpack.c.bf16 %v610_v20, %v609_v19  ;;  %v60_v53 = vld [vmem:[#allocation2 + $0x58] sm:$0xff] }
  0x39   :  { %193 = vperm.xlu1 %919, %v166_v23   ;;  %v885_v12 = vpack.c.bf16 %v608_v11, %v607_v10  ;;  %896 = vmatprep.subr.bf16.mxu1 %v1027_v8  ;;  %v594_v23 = vld [vmem:[#allocation5 + $0x78] sm:$0xff]  ;;  %v70_v20 = vld [vmem:[#allocation2 + $0xa8] sm:$0xff] }
  0x3a   :  { %876 = vmatpush3.bf16.msra.mxu0 %v875_v56  ;;  %v68_v19 = vld [vmem:[#allocation2 + $0x98] sm:$0xff] }
  0x3b   :  { %190 = vperm.xlu0 %920, %v162_v24   ;;  %878 = vmatprep.subr.bf16.mxu0 %v877_v59  ;;  %v615_v24 = vld [vmem:[#allocation5 + $0x120] sm:$0xff] }
  0x3c   :  { %898 = vmatpush3.bf16.msra.mxu1 %v897_v18  ;;  %v900_v27 = vpack.c.bf16 %v616_v25, %v615_v24 }
  0x3d   :  { %199 = vperm.xlu1 %919, %v174_v26   ;;  %v891_v26 = vpack.c.bf16 %v594_v23, %v593_v21  ;;  %899 = vmatprep.subr.bf16.mxu1 %v1027_v8  ;;  %v69_v23 = vld [vmem:[#allocation2 + $0xa0] sm:$0xff] }
  0x3e   :  { %880 = vmatpush3.bf16.msra.mxu0 %v879_v62 }
  0x3f   :  { %196 = vperm.xlu0 %920, %v170_v28   ;;  %882 = vmatprep.subr.bf16.mxu0 %v881_v1  ;;  %v1030_v28 = vmov 0.0  }
  0x40   :  { %902 = vmatpush3.bf16.msk.msra.mxu1 %vm901_vm2, %v900_v27  ;;  %858 = vmatprep.mubr.msk.f32.mxu1 %vm1029_vm3, %v1030_v28 }
  0x41   :  { %205 = vperm.xlu1 %919, %v182_v30   ;;  %v49_v30 = vld [vmem:[#allocation2] sm:$0xff] }
  0x42   :  { %884 = vmatpush3.bf16.msra.mxu0 %v883_v6 }
  0x43   :  { %202 = vperm.xlu0 %920, %v178_v31   ;;  %886 = vmatprep.subr.bf16.mxu0 %v885_v12  ;;  %v50_v31 = vld [vmem:[#allocation2 + $0x8] sm:$0xff]  ;;  %v67_v12 = vld [vmem:[#allocation2 + $0x90] sm:$0xff] }
  0x46   :  { %888 = vmatpush3.bf16.msra.mxu0 %v887_v16 }
  0x47   :  { %459 = vperm.xlu0 %920, %v922_v35   ;;  %890 = vmatprep.subr.bf16.mxu0 %v889_v22  ;;  %v53_v35 = vld [vmem:[#allocation2 + $0x20] sm:$0xff] }
  0x4a   :  { %892 = vmatpush3.bf16.msra.mxu0 %v891_v26 }
  0xb4   :  { %v185_v34 = vpop.permute.xlu1 %184 }
  0xb5   :  { %vm207_vm5 = vcmp.lt.s32.totalorder %v1087_v4, %v185_v34  ;;  %vm208_vm6 = vcmp.lt.s32.totalorder %v1095_v29, %v185_v34 }
  0xb6   :  { %v223_v37 = vsel %vm207_vm5, %v49_v30, 0.0  ;;  %v224_v38 = vsel %vm207_vm5, %v50_v31, 0.0  ;;  %v225_v39 = vsel %vm207_vm5, %v51_v32, 0.0  ;;  %v226_v40 = vsel %vm208_vm6, %v52_v33, 0.0  ;;  %v188_v41 = vpop.permute.xlu0 %187  ;;  %v71_v30 = vld [vmem:[#allocation2 + $0xb0] sm:$0xff]  ;;  %v72_v31 = vld [vmem:[#allocation2 + $0xb8] sm:$0xff] }
  0xb7   :  { %v227_v44 = vsel %vm208_vm6, %v53_v35, 0.0  ;;  %v228_v45 = vsel %vm208_vm6, %v54_v36, 0.0  ;;  %v271_v46 = vadd.f32 %v226_v40, %v223_v37  ;;  %v286_v47 = vsel %vm285_vm4, %v225_v39, 0.0 }
  0xb8   :  { %v278_v51 = vadd.f32 %v227_v44, %v224_v38  ;;  %v287_v52 = vsel %vm285_vm4, %v228_v45, 0.0  ;;  %vm209_vm7 = vcmp.lt.s32.totalorder %v1087_v4, %v188_v41  ;;  %vm210_vm8 = vcmp.lt.s32.totalorder %v1095_v29, %v188_v41  ;;  %v194_v2 = vpop.permute.xlu1 %193 }
  0xb9   :  { %v272_v54 = vrot.slane %v271_v46, 4  ;;  %v288_v55 = vadd.f32 %v287_v52, %v286_v47  ;;  %v229_v56 = vsel %vm209_vm7, %v55_v42, 0.0  ;;  %v230_v57 = vsel %vm209_vm7, %v56_v43, 0.0  ;;  %v61_v52 = vld [vmem:[#allocation2 + $0x60] sm:$0xff] }
  0xba   :  { %v279_v58 = vrot.slane %v278_v51, 4  ;;  %v231_v59 = vsel %vm209_vm7, %v57_v48, 0.0  ;;  %v232_v60 = vsel %vm210_vm8, %v58_v49, 0.0  ;;  %v233_v61 = vsel %vm210_vm8, %v59_v50, 0.0  ;;  %v191_v47 = vpop.permute.xlu0 %190 }
  0xbb   :  { %v273_v62 = vadd.f32 %v272_v54, %v271_v46  ;;  %v289_v63 = vrot.slane %v288_v55, 4  ;;  %v234_v0 = vsel %vm210_vm8, %v60_v53, 0.0  ;;  %v295_v1 = vadd.f32 %v232_v60, %v229_v56 }
  0xbc   :  { %v280_v3 = vadd.f32 %v279_v58, %v278_v51  ;;  %v302_v5 = vadd.f32 %v233_v61, %v230_v57  ;;  %v309_v6 = vsel %vm285_vm4, %v231_v59, 0.0  ;;  %v310_v7 = vsel %vm285_vm4, %v234_v0, 0.0  ;;  %v62_v57 = vld [vmem:[#allocation2 + $0x68] sm:$0xff]  ;;  %v63_v58 = vld [vmem:[#allocation2 + $0x70] sm:$0xff]  ;;  %v64_v59 = vld [vmem:[#allocation2 + $0x78] sm:$0xff] }
  0xbd   :  { %v274_v8 = vrot.slane %v273_v62, 2  ;;  %v290_v9 = vadd.f32 %v289_v63, %v288_v55  ;;  %v296_v10 = vrot.slane %v295_v1, 4  ;;  %v311_v11 = vadd.f32 %v310_v7, %v309_v6  ;;  %v66_v63 = vld [vmem:[#allocation2 + $0x88] sm:$0xff] }
  0xbe   :  { %v281_v13 = vrot.slane %v280_v3, 2  ;;  %v303_v14 = vrot.slane %v302_v5, 4  ;;  %vm213_vm9 = vcmp.lt.s32.totalorder %v1087_v4, %v194_v2  ;;  %vm214_vm10 = vcmp.lt.s32.totalorder %v1095_v29, %v194_v2 }
  0xbf   :  { %v275_v15 = vadd.f32 %v274_v8, %v273_v62  ;;  %v291_v16 = vrot.slane %v290_v9, 2  ;;  %v297_v17 = vadd.f32 %v296_v10, %v295_v1  ;;  %v312_v18 = vrot.slane %v311_v11, 4  ;;  %v65_v62 = vld [vmem:[#allocation2 + $0x80] sm:$0xff] }
  0xc0   :  { %v282_v21 = vadd.f32 %v281_v13, %v280_v3  ;;  %v304_v22 = vadd.f32 %v303_v14, %v302_v5  ;;  %v241_v24 = vsel %vm213_vm9, %v67_v12, 0.0  ;;  %v242_v34 = vsel %vm213_vm9, %v68_v19, 0.0 }
  0xc1   :  { %v276_v25 = vrot.slane %v275_v15, 1  ;;  %v292_v26 = vadd.f32 %v291_v16, %v290_v9  ;;  %v298_v27 = vrot.slane %v297_v17, 2  ;;  %v313_v28 = vadd.f32 %v312_v18, %v311_v11  ;;  %v200_v9 = vpop.permute.xlu1 %199 }
  0xc2   :  { %v283_v32 = vrot.slane %v282_v21, 1  ;;  %v305_v33 = vrot.slane %v304_v22, 2  ;;  %v244_v35 = vsel %vm214_vm10, %v70_v20, 0.0  ;;  %v243_v39 = vsel %vm213_vm9, %v69_v23, 0.0 }
  0xc3   :  { %v293_v36 = vrot.slane %v292_v26, 1  ;;  %v299_v37 = vadd.f32 %v298_v27, %v297_v17  ;;  %v314_v38 = vrot.slane %v313_v28, 2  ;;  %v245_v41 = vsel %vm214_vm10, %v71_v30, 0.0 }
  0xc4   :  { %v306_v40 = vadd.f32 %v305_v33, %v304_v22  ;;  %v246_v42 = vsel %vm214_vm10, %v72_v31, 0.0  ;;  %v1119_v43 = vadd.f32 %v276_v25, %v275_v15  ;;  %v341_v46 = vadd.f32 %v244_v35, %v241_v24  ;;  %v79_v25 = vld [vmem:[#allocation2 + $0xf0] sm:$0xff] }
  0xc5   :  { %v300_v44 = vrot.slane %v299_v37, 1  ;;  %v315_v45 = vadd.f32 %v314_v38, %v313_v28  ;;  %v1121_v48 = vadd.f32 %v283_v32, %v282_v21  ;;  %v348_v49 = vadd.f32 %v245_v41, %v242_v34  ;;  %v81_v32 = vld [vmem:[#allocation2 + $0x100] sm:$0xff]  ;;  %v84_v38 = vld [vmem:[#allocation2 + $0x118] sm:$0xff] }
  0xc6   :  { %v355_v50 = vsel %vm285_vm4, %v243_v39, 0.0  ;;  %v356_v51 = vsel %vm285_vm4, %v246_v42, 0.0  ;;  %v1125_v53 = vadd.f32 %v293_v36, %v292_v26  ;;  %v307_v54 = vrot.slane %v306_v40, 1  ;;  %v80_v26 = vld [vmem:[#allocation2 + $0xf8] sm:$0xff]  ;;  %v82_v36 = vld [vmem:[#allocation2 + $0x108] sm:$0xff] }
  0xc7   :  { %v342_v55 = vrot.slane %v341_v46, 4  ;;  %v357_v56 = vadd.f32 %v356_v51, %v355_v50  ;;  %v1127_v60 = vadd.f32 %v300_v44, %v299_v37  ;;  %v349_v61 = vrot.slane %v348_v49, 4  ;;  %v83_v37 = vld [vmem:[#allocation2 + $0x110] sm:$0xff] }
  0xc8   :  { %vm211_vm11 = vcmp.lt.s32.totalorder %v1087_v4, %v191_v47  ;;  %vm212_vm12 = vcmp.lt.s32.totalorder %v1095_v29, %v191_v47  ;;  %v316_v0 = vrot.slane %v315_v45, 1  ;;  %vm217_vm13 = vcmp.lt.s32.totalorder %v1087_v4, %v200_v9 }
  0xc9   :  { %v343_v1 = vadd.f32 %v342_v55, %v341_v46  ;;  %v358_v2 = vrot.slane %v357_v56, 4  ;;  %v235_v3 = vsel %vm211_vm11, %v61_v52, 0.0  ;;  %v350_v5 = vadd.f32 %v349_v61, %v348_v49  ;;  %v197_v49 = vpop.permute.xlu0 %196 }
  0xca   :  { %v236_v6 = vsel %vm211_vm11, %v62_v57, 0.0  ;;  %v237_v7 = vsel %vm211_vm11, %v63_v58, 0.0  ;;  %v238_v8 = vsel %vm212_vm12, %v64_v59, 0.0  ;;  %v239_v12 = vsel %vm212_vm12, %v65_v62, 0.0 }
  0xcb   :  { %v344_v10 = vrot.slane %v343_v1, 2  ;;  %v359_v11 = vadd.f32 %v358_v2, %v357_v56  ;;  %v240_v13 = vsel %vm212_vm12, %v66_v63, 0.0  ;;  %v351_v14 = vrot.slane %v350_v5, 2  ;;  %v73_v63 = vld [vmem:[#allocation2 + $0xc0] sm:$0xff] }
  0xcc   :  { %v318_v15 = vadd.f32 %v238_v8, %v235_v3  ;;  %v325_v16 = vadd.f32 %v239_v12, %v236_v6  ;;  %v332_v17 = vsel %vm285_vm4, %v237_v7, 0.0  ;;  %v333_v20 = vsel %vm285_vm4, %v240_v13, 0.0  ;;  %v75_v6 = vld [vmem:[#allocation2 + $0xd0] sm:$0xff] }
  0xcd   :  { %v345_v18 = vadd.f32 %v344_v10, %v343_v1  ;;  %v360_v19 = vrot.slane %v359_v11, 2  ;;  %v352_v21 = vadd.f32 %v351_v14, %v350_v5  ;;  %v334_v24 = vadd.f32 %v333_v20, %v332_v17  ;;  %v74_v5 = vld [vmem:[#allocation2 + $0xc8] sm:$0xff]  ;;  %v76_v10 = vld [vmem:[#allocation2 + $0xd8] sm:$0xff] }
  0xce   :  { %v319_v22 = vrot.slane %v318_v15, 4  ;;  %v326_v23 = vrot.slane %v325_v16, 4  ;;  %v1134_v27 = vadd.f32 %v307_v54, %v306_v40  ;;  %v1136_v28 = vadd.f32 %v316_v0, %v315_v45 }
  0xcf   :  { %v346_v30 = vrot.slane %v345_v18, 1  ;;  %v361_v31 = vadd.f32 %v360_v19, %v359_v11  ;;  %v335_v35 = vrot.slane %v334_v24, 4  ;;  %vm218_vm14 = vcmp.lt.s32.totalorder %v1095_v29, %v200_v9  ;;  %v77_v11 = vld [vmem:[#allocation2 + $0xe0] sm:$0xff] }
  0xd0   :  { %v320_v33 = vadd.f32 %v319_v22, %v318_v15  ;;  %v327_v34 = vadd.f32 %v326_v23, %v325_v16  ;;  %v353_v41 = vrot.slane %v352_v21, 1  ;;  %v253_v40 = vsel %vm217_vm13, %v79_v25, 0.0  ;;  %v78_v15 = vld [vmem:[#allocation2 + $0xe8] sm:$0xff] }
  0xd1   :  { %v1139_v39 = vadd.f32 %v346_v30, %v345_v18  ;;  %v254_v42 = vsel %vm217_vm13, %v80_v26, 0.0  ;;  %v336_v46 = vadd.f32 %v335_v35, %v334_v24  ;;  %v255_v47 = vsel %vm217_vm13, %v81_v32, 0.0  ;;  %v206_v32 = vpop.permute.xlu1 %205 }
  0xd2   :  { %v321_v44 = vrot.slane %v320_v33, 2  ;;  %v328_v45 = vrot.slane %v327_v34, 2  ;;  %v362_v50 = vrot.slane %v361_v31, 1  ;;  %v256_v51 = vsel %vm218_vm14, %v82_v36, 0.0 }
  0xd3   :  { %v257_v52 = vsel %vm218_vm14, %v83_v37, 0.0  ;;  %v258_v54 = vsel %vm218_vm14, %v84_v38, 0.0  ;;  %v337_v57 = vrot.slane %v336_v46, 2  ;;  %v387_v58 = vadd.f32 %v256_v51, %v253_v40 }
  0xd4   :  { %v322_v55 = vadd.f32 %v321_v44, %v320_v33  ;;  %v329_v56 = vadd.f32 %v328_v45, %v327_v34  ;;  %v394_v59 = vadd.f32 %v257_v52, %v254_v42  ;;  %v401_v61 = vsel %vm285_vm4, %v255_v47, 0.0  ;;  %v92_v47 = vld [vmem:[#allocation2 + $0x158] sm:$0xff]  ;;  %v93_v52 = vld [vmem:[#allocation2 + $0x160] sm:$0xff] }
  0xd5   :  { %v402_v62 = vsel %vm285_vm4, %v258_v54, 0.0  ;;  %vm215_vm15 = vcmp.lt.s32.totalorder %v1087_v4, %v197_v49  ;;  %v1150_v0 = vadd.f32 %v353_v41, %v352_v21  ;;  %v338_v2 = vadd.f32 %v337_v57, %v336_v46  ;;  %v91_v46 = vld [vmem:[#allocation2 + $0x150] sm:$0xff]  ;;  %v94_v54 = vld [vmem:[#allocation2 + $0x168] sm:$0xff] }
  0xd6   :  { %v323_v1 = vrot.slane %v322_v55, 1  ;;  %v388_v3 = vrot.slane %v387_v58, 4  ;;  %v1152_v7 = vadd.f32 %v362_v50, %v361_v31  ;;  %v395_v8 = vrot.slane %v394_v59, 4 }
  0xd7   :  { %v403_v9 = vadd.f32 %v402_v62, %v401_v61  ;;  %vm216_vm0 = vcmp.lt.s32.totalorder %v1095_v29, %v197_v49  ;;  %v330_v13 = vrot.slane %v329_v56, 1  ;;  %v247_v16 = vsel %vm215_vm15, %v73_v63, 0.0  ;;  %v96_v61 = vld [vmem:[#allocation2 + $0x178] sm:$0xff] }
  0xd8   :  { %v1155_v12 = vadd.f32 %v323_v1, %v322_v55  ;;  %v389_v14 = vadd.f32 %v388_v3, %v387_v58  ;;  %v396_v17 = vadd.f32 %v395_v8, %v394_v59  ;;  %v248_v19 = vsel %vm215_vm15, %v74_v5, 0.0  ;;  %v95_v55 = vld [vmem:[#allocation2 + $0x170] sm:$0xff] }
  0xd9   :  { %v404_v18 = vrot.slane %v403_v9, 4  ;;  %v249_v20 = vsel %vm215_vm15, %v75_v6, 0.0  ;;  %v339_v21 = vrot.slane %v338_v2, 1  ;;  %v250_v23 = vsel %vm216_vm0, %v76_v10, 0.0 }
  0xda   :  { %v390_v22 = vrot.slane %v389_v14, 2  ;;  %v251_v24 = vsel %vm216_vm0, %v77_v11, 0.0  ;;  %v397_v25 = vrot.slane %v396_v17, 2  ;;  %v252_v30 = vsel %vm216_vm0, %v78_v15, 0.0 }
  0xdb   :  { %v405_v26 = vadd.f32 %v404_v18, %v403_v9  ;;  %v364_v31 = vadd.f32 %v250_v23, %v247_v16  ;;  %v371_v34 = vadd.f32 %v251_v24, %v248_v19  ;;  %v378_v35 = vsel %vm285_vm4, %v249_v20, 0.0  ;;  %v203_v9 = vpop.permute.xlu0 %202 }
  0xdc   :  { %v391_v33 = vadd.f32 %v390_v22, %v389_v14  ;;  %v379_v36 = vsel %vm285_vm4, %v252_v30, 0.0  ;;  %v398_v37 = vadd.f32 %v397_v25, %v396_v17  ;;  %v1171_v42 = vadd.f32 %v330_v13, %v329_v56  ;;  %v85_v22 = vld [vmem:[#allocation2 + $0x120] sm:$0xff]  ;;  %v86_v30 = vld [vmem:[#allocation2 + $0x128] sm:$0xff] }
  0xdd   :  { %v406_v38 = vrot.slane %v405_v26, 2  ;;  %v365_v41 = vrot.slane %v364_v31, 4  ;;  %v380_v40 = vadd.f32 %v379_v36, %v378_v35  ;;  %v372_v45 = vrot.slane %v371_v34, 4  ;;  %v89_v36 = vld [vmem:[#allocation2 + $0x140] sm:$0xff] }
  0xde   :  { %v392_v44 = vrot.slane %v391_v33, 1  ;;  %vm221_vm1 = vcmp.lt.s32.totalorder %v1087_v4, %v206_v32  ;;  %vm222_vm2 = vcmp.lt.s32.totalorder %v1095_v29, %v206_v32  ;;  %v1175_v57 = vadd.f32 %v339_v21, %v338_v2  ;;  %v88_v32 = vld [vmem:[#allocation2 + $0x138] sm:$0xff] }
  0xdf   :  { %v407_v49 = vadd.f32 %v406_v38, %v405_v26  ;;  %v366_v50 = vadd.f32 %v365_v41, %v364_v31  ;;  %v381_v51 = vrot.slane %v380_v40, 4  ;;  %v399_v56 = vrot.slane %v398_v37, 1  ;;  %v87_v31 = vld [vmem:[#allocation2 + $0x130] sm:$0xff] }
  0xe0   :  { %v1177_v58 = vadd.f32 %v392_v44, %v391_v33  ;;  %v373_v59 = vadd.f32 %v372_v45, %v371_v34  ;;  %v265_v1 = vsel %vm221_vm1, %v91_v46, 0.0  ;;  %v266_v3 = vsel %vm221_vm1, %v92_v47, 0.0  ;;  %v90_v44 = vld [vmem:[#allocation2 + $0x148] sm:$0xff] }
  0xe1   :  { %v367_v62 = vrot.slane %v366_v50, 2  ;;  %v382_v63 = vadd.f32 %v381_v51, %v380_v40  ;;  %v267_v6 = vsel %vm221_vm1, %v93_v52, 0.0  ;;  %v268_v2 = vsel %vm222_vm2, %v94_v54, 0.0 }
  0xe2   :  { %v374_v5 = vrot.slane %v373_v59, 2  ;;  %v269_v8 = vsel %vm222_vm2, %v95_v55, 0.0  ;;  %v408_v10 = vrot.slane %v407_v49, 1  ;;  %v270_v14 = vsel %vm222_vm2, %v96_v61, 0.0  ;;  %v1208_v61 = vpop.permute.xlu0 %459 }
  0xe3   :  { %v368_v11 = vadd.f32 %v367_v62, %v366_v50  ;;  %v383_v13 = vrot.slane %v382_v63, 2  ;;  %v433_v16 = vadd.f32 %v268_v2, %v265_v1  ;;  %v440_v17 = vadd.f32 %v269_v8, %v266_v3 }
  0xe4   :  { %v375_v15 = vadd.f32 %v374_v5, %v373_v59  ;;  %v447_v18 = vsel %vm285_vm4, %v267_v6, 0.0  ;;  %v448_v21 = vsel %vm285_vm4, %v270_v14, 0.0  ;;  %vm219_vm3 = vcmp.lt.s32.totalorder %v1087_v4, %v203_v9 }
  0xe5   :  { %v369_v19 = vrot.slane %v368_v11, 1  ;;  %v384_v20 = vadd.f32 %v383_v13, %v382_v63  ;;  %v1194_v23 = vadd.f32 %v399_v56, %v398_v37  ;;  %v434_v24 = vrot.slane %v433_v16, 4 }
  0xe6   :  { %v441_v25 = vrot.slane %v440_v17, 4  ;;  %v449_v26 = vadd.f32 %v448_v21, %v447_v18  ;;  %v1196_v33 = vadd.f32 %v408_v10, %v407_v49  ;;  %v376_v35 = vrot.slane %v375_v15, 1 }
  0xe7   :  { %v1198_v34 = vadd.f32 %v369_v19, %v368_v11  ;;  %vm220_vm5 = vcmp.lt.s32.totalorder %v1095_v29, %v203_v9  ;;  %v435_v38 = vadd.f32 %v434_v24, %v433_v16  ;;  %v259_v37 = vsel %vm219_vm3, %v85_v22, 0.0 }
  0xe8   :  { %v442_v41 = vadd.f32 %v441_v25, %v440_v17  ;;  %v450_v40 = vrot.slane %v449_v26, 4  ;;  %v385_v45 = vrot.slane %v384_v20, 1  ;;  %v260_v46 = vsel %vm219_vm3, %v86_v30, 0.0 }
  0xe9   :  { %v261_v47 = vsel %vm219_vm3, %v87_v31, 0.0  ;;  %v262_v49 = vsel %vm220_vm5, %v88_v32, 0.0  ;;  %v436_v50 = vrot.slane %v435_v38, 2  ;;  %v263_v54 = vsel %vm220_vm5, %v89_v36, 0.0 }
  0xea   :  { %v443_v51 = vrot.slane %v442_v41, 2  ;;  %v451_v52 = vadd.f32 %v450_v40, %v449_v26  ;;  %v264_v29 = vsel %vm220_vm5, %v90_v44, 0.0  ;;  %v410_v55 = vadd.f32 %v262_v49, %v259_v37 }
  0xeb   :  { %v417_v56 = vadd.f32 %v263_v54, %v260_v46  ;;  %v424_v59 = vsel %vm285_vm4, %v261_v47, 0.0  ;;  %vm525_vm6 = vcmask 1041409   ;;  %v437_v62 = vadd.f32 %v436_v50, %v435_v38 }
  0xec   :  { %v444_v63 = vadd.f32 %v443_v51, %v442_v41  ;;  %v452_v1 = vrot.slane %v451_v52, 2  ;;  %v425_v3 = vsel %vm285_vm4, %v264_v29, 0.0  ;;  %vm528_vm7 = vcmask 1042434  }
  0xed   :  { %v377_v4 = vadd.f32 %v376_v35, %v375_v15  ;;  %v411_v5 = vrot.slane %v410_v55, 4  ;;  %v418_v6 = vrot.slane %v417_v56, 4  ;;  %v426_v2 = vadd.f32 %v425_v3, %v424_v59 }
  0xee   :  { %vm531_vm8 = vcmask 1043459   ;;  %v1211_v8 = vadd.f32 %v385_v45, %v384_v20  ;;  %v438_v9 = vrot.slane %v437_v62, 1  ;;  %v445_v10 = vrot.slane %v444_v63, 1 }
  0xef   :  { %v1214_v11 = vrot.slane %v1208_v61, 1  ;;  %vm534_vm9 = vcmask 1044484   ;;  %v412_v13 = vadd.f32 %v411_v5, %v410_v55  ;;  %v419_v14 = vadd.f32 %v418_v6, %v417_v56 }
  0xf0   :  { %v427_v16 = vrot.slane %v426_v2, 4  ;;  %v1217_v17 = vrot.slane %v1208_v61, 3  ;;  %v453_v18 = vadd.f32 %v452_v1, %v451_v52  ;;  %v446_v15 = vadd.f32 %v445_v10, %v444_v63 }
  0xf1   :  { %v1220_v19 = vrot.slane %v1208_v61, 2  ;;  %v1223_v20 = vrot.slane %v1208_v61, 4  ;;  %v413_v21 = vrot.slane %v412_v13, 2  ;;  %v420_v22 = vrot.slane %v419_v14, 2 }
  0xf2   :  { %v428_v24 = vadd.f32 %v427_v16, %v426_v2  ;;  %v1226_v25 = vrot.slane %v1208_v61, 5  ;;  %vm537_vm10 = vcmask 1045509   ;;  %v1229_v26 = vrot.slane %v1208_v61, 7 }
  0xf3   :  { %v477_v30 = vmul.f32 %v1208_v61, %v1121_v48  ;;  %v480_v31 = vmul.f32 %v1214_v11, %v1134_v27  ;;  %v483_v32 = vmul.f32 %v1220_v19, %v1171_v42  ;;  %vm540_vm11 = vcmask 1046534  }
  0xf4   :  { %v414_v35 = vadd.f32 %v413_v21, %v412_v13  ;;  %v421_v36 = vadd.f32 %v420_v22, %v419_v14  ;;  %v429_v38 = vrot.slane %v428_v24, 2  ;;  %v486_v41 = vmul.f32 %v1217_v17, %v1150_v0 }
  0xf5   :  { %vm543_vm12 = vcmask 1047559   ;;  %v489_v40 = vmul.f32 %v1223_v20, %v377_v4  ;;  %v492_v44 = vmul.f32 %v1226_v25, %v1194_v23  ;;  %v498_v48 = vmul.f32 %v1229_v26, %v446_v15 }
  0xf6   :  { %v545_v37 = vrot.slane %v480_v31, 7  ;;  %v415_v27 = vrot.slane %v414_v35, 1  ;;  %v422_v45 = vrot.slane %v421_v36, 1  ;;  %v430_v46 = vadd.f32 %v429_v38, %v428_v24 }
  0xf7   :  { %v547_v42 = vrot.slane %v483_v32, 6  ;;  %v454_v47 = vrot.slane %v453_v18, 1  ;;  %v549_v50 = vrot.slane %v486_v41, 5  ;;  %v551_v51 = vrot.slane %v489_v40, 4 }
  0xf8   :  { %v546_v49 = vsel %vm525_vm6, %v545_v37, %v477_v30  ;;  %v431_v52 = vrot.slane %v430_v46, 1  ;;  %v423_v0 = vadd.f32 %v422_v45, %v421_v36  ;;  %v466_v54 = vrot.slane %v1208_v61, 6 }
  0xf9   :  { %v548_v29 = vsel %vm528_vm7, %v547_v42, %v546_v49  ;;  %v553_v55 = vrot.slane %v492_v44, 3  ;;  %v416_v56 = vadd.f32 %v415_v27, %v414_v35  ;;  %v439_v59 = vadd.f32 %v438_v9, %v437_v62 }
  0xfa   :  { %v550_v23 = vsel %vm531_vm8, %v549_v50, %v548_v29  ;;  %v495_v63 = vmul.f32 %v466_v54, %v423_v0  ;;  %v557_v3 = vrot.slane %v498_v48, 1  ;;  %v479_v4 = vmul.f32 %v1214_v11, %v1127_v60 }
  0xfb   :  { %v552_v1 = vsel %vm534_vm9, %v551_v51, %v550_v23  ;;  %v476_v5 = vmul.f32 %v1208_v61, %v1119_v43  ;;  %v482_v6 = vmul.f32 %v1220_v19, %v1155_v12  ;;  %v485_v2 = vmul.f32 %v1217_v17, %v1139_v39 }
  0xfc   :  { %v488_v10 = vmul.f32 %v1223_v20, %v1198_v34  ;;  %v432_v62 = vadd.f32 %v431_v52, %v430_v46  ;;  %v555_v9 = vrot.slane %v495_v63, 2  ;;  %v491_v13 = vmul.f32 %v1226_v25, %v1177_v58 }
  0xfd   :  { %v494_v14 = vmul.f32 %v466_v54, %v416_v56  ;;  %v554_v60 = vsel %vm537_vm10, %v553_v55, %v552_v1  ;;  %v497_v16 = vmul.f32 %v1229_v26, %v439_v59  ;;  %v524_v43 = vrot.slane %v479_v4, 7 }
  0xfe   :  { %v527_v15 = vrot.slane %v482_v6, 6  ;;  %v556_v12 = vsel %vm540_vm11, %v555_v9, %v554_v60  ;;  %v530_v21 = vrot.slane %v485_v2, 5  ;;  %v533_v22 = vrot.slane %v488_v10, 4 }
  0xff   :  { %v536_v39 = vrot.slane %v491_v13, 3  ;;  %v558_v24 = vsel %vm543_vm12, %v557_v3, %v556_v12  ;;  %v526_v34 = vsel %vm525_vm6, %v524_v43, %v476_v5  ;;  %v539_v30 = vrot.slane %v494_v14, 2 }
 0x100   :  { %v455_v31 = vadd.f32 %v454_v47, %v453_v18  ;;  %577 = vst [vmem:[#allocation7 + $0x8] sm:$0xff] %v558_v24  ;;  %694 = vmatprep.mubr.f32.mxu0 %v558_v24  ;;  %v529_v58 = vsel %vm528_vm7, %v527_v15, %v526_v34  ;;  %v481_v32 = vmul.f32 %v1214_v11, %v1136_v28 }
 0x101   :  { %v484_v35 = vmul.f32 %v1220_v19, %v1175_v57  ;;  %v487_v36 = vmul.f32 %v1217_v17, %v1152_v7  ;;  %v532_v38 = vsel %vm531_vm8, %v530_v21, %v529_v58  ;;  %v478_v41 = vmul.f32 %v1208_v61, %v1125_v53 }
 0x102   :  { %v490_v18 = vmul.f32 %v1223_v20, %v1211_v8  ;;  %v496_v40 = vmul.f32 %v466_v54, %v432_v62  ;;  %v535_v44 = vsel %vm534_vm9, %v533_v22, %v532_v38  ;;  %v493_v28 = vmul.f32 %v1226_v25, %v1196_v33 }
 0x103   :  { %v559_v11 = vrot.slane %v481_v32, 7  ;;  %v561_v48 = vrot.slane %v484_v35, 6  ;;  %v538_v57 = vsel %vm537_vm10, %v536_v39, %v535_v44  ;;  %v542_v19 = vrot.slane %v497_v16, 1 }
 0x104   :  { %v565_v7 = vrot.slane %v490_v18, 4  ;;  %v541_v17 = vsel %vm540_vm11, %v539_v30, %v538_v57  ;;  %v499_v37 = vmul.f32 %v1229_v26, %v455_v31  ;;  %v563_v61 = vrot.slane %v487_v36, 5 }
 0x105   :  { %v560_v53 = vsel %vm525_vm6, %v559_v11, %v478_v41  ;;  %v544_v8 = vsel %vm543_vm12, %v542_v19, %v541_v17  ;;  %v569_v27 = vrot.slane %v496_v40, 2  ;;  %v567_v25 = vrot.slane %v493_v28, 3 }
 0x106   :  { %v562_v20 = vsel %vm528_vm7, %v561_v48, %v560_v53  ;;  %576 = vst [vmem:[#allocation7] sm:$0xff] %v544_v8  ;;  %695 = vmatmul.mubr.f32.vlgmr.msra.gmra.mrb[0].mxu0 %v544_v8  ;;  %v571_v42 = vrot.slane %v499_v37, 1 }
 0x107   :  { %v564_v33 = vsel %vm531_vm8, %v563_v61, %v562_v20 }
 0x108   :  { %v566_v45 = vsel %vm534_vm9, %v565_v7, %v564_v33 }
 0x109   :  { %v568_v46 = vsel %vm537_vm10, %v567_v25, %v566_v45 }
 0x10a   :  { %v570_v26 = vsel %vm540_vm11, %v569_v27, %v568_v46 }
 0x10b   :  { %v572_v47 = vsel %vm543_vm12, %v571_v42, %v570_v26 }
 0x10c   :  { %859 = vmatmul.mubr.msk.f32.vlgmr.msra.gmra.mrb[0].mxu1 %vm285_vm4, %v572_v47  ;;  %578 = vst.msk [vmem:[#allocation7 + $0x10] sm:$0xff] %vm285_vm4, %v572_v47 }
 0x10d   :  { %978 = shalt.err (!%p975_p6)
}
 0x10e   :  { %s979_s25 = scalar_lea.hbm %s1324_s4, 384 }
 0x10f   :  { %p980_p7 = scmp.ne.s32.totalorder %s1324_s4, %s979_s25  ;;  %p983_p8 = scmp.lt.u32.totalorder %s979_s25, %s1324_s4 }
 0x111   :  { %p985_p9 = pnand %p983_p8, %p980_p7 }
 0x113   :  { %988 = shalt.err (!%p985_p9)
}
 0x114   :  { %780 = dma.vmem_to_hbm [thread:$0]  %s778_s2, 384, %s1324_s4, [#allocation4]   ;;  %v801_v50 = vld [vmem:[%s1323_s3] ss:$0 sm:$0xff] }
 0x115   :  { %s1032_s9 = smov [#allocation8]  }
 0x116   :  { %s787_s10 = sshll.u32 %s1032_s9, 4  ;;  %s788_s10 = int_to_ptr.vmem [resolvable:$true] %s787_s10 }
 0x117   :  { %s989_s11 = scalar_lea.vmem %s788_s10, 128  ;;  %p994_p11 = scmp.lt.s32.totalorder %s788_s10, %s788_s10 }
 0x118   :  { %p990_p10 = scmp.ne.s32.totalorder %s788_s10, %s989_s11  ;;  %p995_p12 = scmp.lt.s32.totalorder %s989_s11, %s989_s11 }
 0x11a   :  { %p996_p13 = por %p995_p12, %p994_p11 }
 0x11c   :  { %p997_p0 = pnand %p996_p13, %p990_p10 }
 0x1d9   :  { %v836_v49 = vpop.f32.mrb[0].mxu0 }
 0x1da   :  { %v837_v51 = vpop.f32.mrb[1].mxu0 }
 0x1db   :  { %v838_v52 = vadd.f32 %v837_v51, %v836_v49 }
 0x1dd   :  { %v697_v0 = vadd.f32 %v838_v52, %v801_v50 }
 0x1df   :  { %v766_v54 = vpop.f32.mrb[0].mxu1 }
 0x1e0   :  { %v860_v29 = vpop.f32.mrb[1].mxu1  ;;  %v767_v23 = vadd.f32 %v766_v54, %v697_v0 }
 0x1e2   :  { %770 = vst [vmem:[#allocation8] sm:$0xff] %v767_v23 }
 0x1e3   :  { %1000 = shalt.err (!%p997_p0)
}
 0x1e4   :  { %s1001_s3 = scalar_lea.hbm %s1325_s5, 128 }
 0x1e5   :  { %p1002_p1 = scmp.ne.s32.totalorder %s1325_s5, %s1001_s3  ;;  %p1005_p2 = scmp.lt.u32.totalorder %s1001_s3, %s1325_s5 }
 0x1e7   :  { %p1007_p3 = pnand %p1005_p2, %p1002_p1 }
 0x1e9   :  { %1010 = shalt.err (!%p1007_p3)
}
 0x1ea   :  { %790 = dma.vmem_to_hbm [thread:$0]  %s788_s10, 128, %s1325_s5, [#allocation9]  }
 0x1eb   :  { %1015 = dma.done.wait [#allocation4], 384  }
 0x1ec   :  { %1016 = vsyncadd [#allocation4], 4294966912 }
 0x1ed   :  { %1017 = dma.done.wait [#allocation9], 128  }
 0x1ee   :  { %1018 = vsyncadd [#allocation9], 4294967168 }
 0x1ef   :  { %797 = vsyncpa [#allocation3], 1 }
 0x1f0   :  { %798 = vsyncpa [#allocation6], 1 }
 0x1f1   :  { %799 = vsyncpa [#allocation4], 1 }
 0x1f2   :  { %800 = vsyncpa [#allocation9], 1 }

</bundles_post_ra>
